<compile_context>
chip_gen: v5e
topology: v5e:2x2
jax: 0.10.0
libtpu: 0.0.40
codegen_flags: <defaults>
</compile_context>

<pallas_src>
import jax
import jax.numpy as jnp
from jax.experimental import pallas as pl
from jax.experimental.pallas import tpu as pltpu


# ---------------------------------------------------------------------------
# Kernel bodies
# ---------------------------------------------------------------------------

def _conv1d_kernel_single_k(x_ref, w_ref, b_ref, o_ref):
    # Whole reduction in one MXU pass: out = x @ W + b. No scratch, no RMW.
    acc = jnp.dot(x_ref[...], w_ref[...], preferred_element_type=jnp.float32)
    o_ref[...] = (acc + b_ref[...].astype(jnp.float32)).astype(o_ref.dtype)


def _conv1d_kernel_multi_k_f32(x_ref, w_ref, b_ref, o_ref):
    # K tiled and output is f32: accumulate directly into o_ref (resident
    # across the K axis) — no separate accumulator scratch needed.
    k = pl.program_id(2)

    @pl.when(k == 0)
    def _():
        o_ref[...] = jnp.broadcast_to(
            b_ref[...].astype(jnp.float32), o_ref.shape
        )

    o_ref[...] += jnp.dot(
        x_ref[...], w_ref[...], preferred_element_type=jnp.float32
    )


def _conv1d_kernel_multi_k(x_ref, w_ref, b_ref, o_ref, acc_ref):
    # K tiled, non-f32 output: f32 VMEM accumulator, bias added once in the
    # K-epilogue, single cast on writeback.
    k = pl.program_id(2)

    @pl.when(k == 0)
    def _():
        acc_ref[...] = jnp.zeros_like(acc_ref)

    acc_ref[...] += jnp.dot(
        x_ref[...], w_ref[...], preferred_element_type=jnp.float32
    )

    @pl.when(k == pl.num_programs(2) - 1)
    def _():
        o_ref[...] = (acc_ref[...] + b_ref[...].astype(jnp.float32)).astype(
            o_ref.dtype
        )


# ---------------------------------------------------------------------------
# Tile / budget selection helpers (trace-time Python on static shapes)
# ---------------------------------------------------------------------------

def _round_up(v, m):
    return -(-v // m) * m


def _vmem_budget_bytes():
    """Per-generation VMEM budget: ~3/4 of physical VMEM, capped at 96 MiB.
    v5e/v6e (128 MiB) -> 96 MiB, v7x (64 MiB/TC) -> 48 MiB; 48 MiB fallback."""
    phys = 64 * 1024 * 1024  # conservative default = v7x per-TensorCore VMEM
    try:
        info = pltpu.get_tpu_info()
        phys = int(getattr(info, "vmem_capacity_bytes", phys) or phys)
    except Exception:
        pass
    return min(phys * 3 // 4, 96 * 1024 * 1024)


def _pick_tile(dim, align, cap):
    """Largest tile (multiple of `align`, <= cap) minimizing padding of `dim`.
    Never goes below cap//2 so per-grid-step overhead stays amortized."""
    cap = max(align, cap - cap % align)
    dim_a = _round_up(dim, align)
    if dim_a <= cap:
        return dim_a  # one block along this axis; minimal possible padding
    best_t, best_pad = cap, _round_up(dim_a, cap) - dim
    t = cap - align
    while t >= max(align, cap // 2) and best_pad > dim_a - dim:
        pad = _round_up(dim_a, t) - dim
        if pad < best_pad:
            best_t, best_pad = t, pad
        t -= align
    return best_t


def _pick_k_tile(nx, cap):
    """Full (128-aligned) K when it fits; otherwise the largest multiple of
    128 <= cap that divides the aligned K (no K padding beyond alignment)."""
    k_a = _round_up(nx, 128)
    cap = max(128, cap - cap % 128)
    if k_a <= cap:
        return k_a
    for t in range(cap, 127, -128):
        if k_a % t == 0:
            return t
    return cap


# ---------------------------------------------------------------------------
# Wrapper
# ---------------------------------------------------------------------------

def conv1d_forward(x, weight, bias, *, compute_dtype=None, tm_cap=512,
                   tn_cap=512):
    """GPT-2 Conv1D forward: x[..., nx] @ weight[nx, nf] + bias[nf].

    compute_dtype: optionally cast x/weight (e.g. jnp.bfloat16 on v6e/v7x)
    before the GEMM; accumulation stays f32 and the output keeps x.dtype.
    """
    *lead, nx = x.shape
    nf = weight.shape[1]
    assert weight.shape[0] == nx and bias.shape == (nf,)

    out_dtype = x.dtype
    in_dtype = jnp.dtype(compute_dtype if compute_dtype is not None else x.dtype)
    in_item = in_dtype.itemsize
    out_item = jnp.dtype(out_dtype).itemsize
    sublane = max(8, 32 // in_item)  # f32 -> 8, bf16 -> 16, int8 -> 32

    x2d = x.reshape(-1, nx)  # glue reshape in plain JAX
    m = x2d.shape[0]

    budget = _vmem_budget_bytes()

    # ---- M / N tiles -------------------------------------------------------
    if budget >= 72 * 1024 * 1024 and m >= 2 * tm_cap:
        tm_cap = max(tm_cap, 1024)  # 128 MiB-VMEM chips: bigger M tiles
    tm_ = _pick_tile(m, sublane, tm_cap)
    tn_ = _pick_tile(nf, 128, tn_cap)

    mp = _round_up(m, tm_)
    np_ = _round_up(nf, tn_)

    # v7x has 2 TensorCores: if both "parallel" axes collapsed to one block,
    # split N so at least one axis has >= 2 blocks (cheap on 1-TC chips).
    if mp // tm_ == 1 and np_ // tn_ == 1 and np_ >= 256:
        for t in range(np_ // 2 - (np_ // 2) % 128, 127, -128):
            if np_ % t == 0:
                tn_ = t
                break

    # ---- K tile from remaining VMEM budget ----------------------------------
    # Reserve: double-buffered output tile + (worst-case) f32 acc + slack.
    fixed = 2 * tm_ * tn_ * out_item + tm_ * tn_ * 4 + (1 << 20)
    k_bytes = max(budget - fixed, 2 * 128 * (tm_ + tn_) * in_item)
    tk_cap = max(128, (k_bytes // (2 * (tm_ + tn_) * in_item)) // 128 * 128)
    tk_ = _pick_k_tile(nx, tk_cap)
    kp = _round_up(nx, tk_)

    grid_m, grid_n, grid_k = mp // tm_, np_ // tn_, kp // tk_

    # ---- padding (zero-pad: K padding contributes 0; extra rows/cols sliced
    # off). Weight/bias are call-invariant — in a real model pre-pad them once
    # outside the hot path; here the pads are skipped when already aligned. ---
    if (mp, kp) != (m, nx):
        x2d = jnp.pad(x2d, ((0, mp - m), (0, kp - nx)))
    w_p = weight
    if (kp, np_) != (nx, nf):
        w_p = jnp.pad(weight, ((0, kp - nx), (0, np_ - nf)))
    b2d = bias.reshape(1, nf)
    if np_ != nf:
        b2d = jnp.pad(b2d, ((0, 0), (0, np_ - nf)))

    if compute_dtype is not None:
        x2d = x2d.astype(in_dtype)
        w_p = w_p.astype(in_dtype)

    # ---- kernel / specs -----------------------------------------------------
    if grid_k == 1:
        kernel = _conv1d_kernel_single_k
        grid = (grid_m, grid_n)
        in_specs = [
            pl.BlockSpec((tm_, tk_), lambda i, j: (i, 0)),
            pl.BlockSpec((tk_, tn_), lambda i, j: (0, j)),
            pl.BlockSpec((1, tn_), lambda i, j: (0, j)),
        ]
        out_specs = pl.BlockSpec((tm_, tn_), lambda i, j: (i, j))
        scratch = []
        dims = ("parallel", "parallel")
    else:
        grid = (grid_m, grid_n, grid_k)
        in_specs = [
            pl.BlockSpec((tm_, tk_), lambda i, j, k: (i, k)),
            pl.BlockSpec((tk_, tn_), lambda i, j, k: (k, j)),
            pl.BlockSpec((1, tn_), lambda i, j, k: (0, j)),
        ]
        out_specs = pl.BlockSpec((tm_, tn_), lambda i, j, k: (i, j))
        dims = ("parallel", "parallel", "arbitrary")
        if jnp.dtype(out_dtype) == jnp.dtype(jnp.float32):
            kernel = _conv1d_kernel_multi_k_f32
            scratch = []  # accumulate straight into the resident o_ref tile
        else:
            kernel = _conv1d_kernel_multi_k
            scratch = [pltpu.VMEM((tm_, tn_), jnp.float32)]

    # Truthful HBM traffic for XLA scheduling: x streamed once per N-block
    # column, W (and bias) once per M-block row.
    cost = pl.CostEstimate(
        flops=2 * m * nx * nf,
        transcendentals=0,
        bytes_accessed=int(
            x2d.size * x2d.dtype.itemsize * grid_n
            + w_p.size * w_p.dtype.itemsize * grid_m
            + b2d.size * b2d.dtype.itemsize * grid_m
            + mp * np_ * out_item
        ),
    )

    out2d = pl.pallas_call(
        kernel,
        out_shape=jax.ShapeDtypeStruct((mp, np_), out_dtype),
        grid_spec=pltpu.PrefetchScalarGridSpec(
            num_scalar_prefetch=0,
            grid=grid,
            in_specs=in_specs,
            out_specs=out_specs,
            scratch_shapes=scratch,
        ),
        compiler_params=pltpu.CompilerParams(
            dimension_semantics=dims,
            vmem_limit_bytes=int(budget),
        ),
        cost_estimate=cost,
    )(x2d, w_p, b2d)

    out2d = out2d[:m, :nf]
    return out2d.reshape(*lead, nf)


if __name__ == "__main__":
    # Shapes consistent with the GPT-2 fused-QKV test: nf = 3 * hidden.
    batch, seq, nx = 2, 8, 32
    nf = 3 * nx  # 96

    key = jax.random.PRNGKey(0)
    kx, kw = jax.random.split(key)

    x = jax.random.normal(kx, (batch, seq, nx), dtype=jnp.float32)
    # Deterministic parameter init mirroring nn.init.normal_(weight, std=0.02)
    # and zero bias.
    weight = 0.02 * jax.random.normal(kw, (nx, nf), dtype=jnp.float32)
    bias = jnp.zeros((nf,), dtype=jnp.float32)

    out = conv1d_forward(x, weight, bias)
    out = jax.block_until_ready(out)

    # Reference check in plain JAX (same math as the torch.addmm path).
    ref = x.reshape(-1, nx) @ weight + bias
    ref = ref.reshape(batch, seq, nf)
    assert out.shape == (batch, seq, nf)
    assert jnp.allclose(out, ref, atol=1e-5, rtol=1e-5)

    print("KERNEL_OK")
</pallas_src>

<mosaic_0001>
module attributes {stable_mosaic.version = 11 : i64} {
  func.func @_conv1d_kernel_single_k(%arg0: i32, %arg1: i32, %arg2: memref<16x128xf32, #tpu.memory_space<vmem>>, %arg3: memref<128x128xf32, #tpu.memory_space<vmem>>, %arg4: memref<1x128xf32, #tpu.memory_space<vmem>>, %arg5: memref<16x128xf32, #tpu.memory_space<vmem>>) attributes {dimension_semantics = [#tpu.dimension_semantics<parallel>, #tpu.dimension_semantics<parallel>], iteration_bounds = array<i64: 1, 1>, scalar_prefetch = 0 : i64, scratch_operands = 0 : i64, tpu.core_type = #tpu.core_type<tc>, window_params = [{transform_indices = @transform_0, window_bounds = array<i64: 16, 128>}, {transform_indices = @transform_1, window_bounds = array<i64: 128, 128>}, {transform_indices = @transform_2, window_bounds = array<i64: 1, 128>}, {transform_indices = @transform_3, window_bounds = array<i64: 16, 128>}]} {
    %c0 = arith.constant 0 : index
    %c0_0 = arith.constant 0 : index
    %0 = vector.load %arg2[%c0, %c0_0] : memref<16x128xf32, #tpu.memory_space<vmem>>, vector<16x128xf32>
    %c0_1 = arith.constant 0 : index
    %c0_2 = arith.constant 0 : index
    %1 = vector.load %arg3[%c0_1, %c0_2] : memref<128x128xf32, #tpu.memory_space<vmem>>, vector<128x128xf32>
    %cst = arith.constant dense<0.000000e+00> : vector<16x128xf32>
    %2 = tpu.matmul %0, %1, %cst {dimension_numbers = #tpu.dot_dimension_numbers<[1], [0], [0], [1], [0, 0, 1, 1], [], []>} : vector<16x128xf32>, vector<128x128xf32>, vector<16x128xf32> -> vector<16x128xf32>
    %c0_3 = arith.constant 0 : index
    %c0_4 = arith.constant 0 : index
    %3 = vector.load %arg4[%c0_3, %c0_4] : memref<1x128xf32, #tpu.memory_space<vmem>>, vector<1x128xf32>
    %4 = vector.broadcast %3 : vector<1x128xf32> to vector<16x128xf32>
    %5 = arith.addf %2, %4 : vector<16x128xf32>
    %c0_5 = arith.constant 0 : index
    %c0_6 = arith.constant 0 : index
    %6 = vector.load %arg5[%c0_5, %c0_6] : memref<16x128xf32, #tpu.memory_space<vmem>>, vector<16x128xf32>
    tpu.vector_store %arg5[%c0_5, %c0_6], %5 {strides = array<i32>} : memref<16x128xf32, #tpu.memory_space<vmem>>, vector<16x128xf32>,
    return
  }
  func.func @transform_0(%arg0: i32, %arg1: i32) -> (i32, i32) {
    %c0_i32 = arith.constant 0 : i32
    %c0_i32_0 = arith.constant 0 : i32
    return %arg0, %c0_i32 : i32, i32
  }
  func.func @transform_1(%arg0: i32, %arg1: i32) -> (i32, i32) {
    %c0_i32 = arith.constant 0 : i32
    %c0_i32_0 = arith.constant 0 : i32
    return %c0_i32, %arg1 : i32, i32
  }
  func.func @transform_2(%arg0: i32, %arg1: i32) -> (i32, i32) {
    %c0_i32 = arith.constant 0 : i32
    %c0_i32_0 = arith.constant 0 : i32
    return %c0_i32, %arg1 : i32, i32
  }
  func.func @transform_3(%arg0: i32, %arg1: i32) -> (i32, i32) {
    %c0_i32 = arith.constant 0 : i32
    return %arg0, %arg1 : i32, i32
  }
}

</mosaic_0001>

<bundles_post_ra>
// kernel: tpu_custom_call.1
= control target key start
LH: loop header
LB: loop body
LE: loop exit
PB: predicated region body
PF: predicated region fallthrough
CT: control target
= control target key end

     0   :  { %8 = vsyncpa [#allocation3], 0  ;;  %s260_s0 = inlined_call_operand.hbm [shape: f32[16,128], index: 0, kind: input, shape index: {}]   ;;  %s261_s1 = inlined_call_operand.hbm [shape: f32[128,128], index: 1, kind: input, shape index: {}]   ;;  %s262_s2 = inlined_call_operand.vmem [shape: f32[1,128], index: 2, kind: input, shape index: {}]   ;;  %s263_s3 = inlined_call_operand.hbm [shape: f32[16,128], index: 3, kind: output, shape index: {}]  }
   0x1   :  { %9 = vsyncpa [#allocation6], 0 }
   0x2   :  { %10 = vsyncpa [#allocation4], 0  ;;  %s15_s14 = sshll.u32 %s260_s0, 4  ;;  %s214_s15 = smov [#allocation2]   ;;  %s16_s14 = int_to_ptr.hbm [resolvable:$true] %s15_s14 }
   0x3   :  { %s17_s16 = sshll.u32 %s214_s15, 4  ;;  %s28_s19 = sshll.u32 %s261_s1, 4  ;;  %s18_s16 = int_to_ptr.vmem [resolvable:$true] %s17_s16  ;;  %s29_s19 = int_to_ptr.hbm [resolvable:$true] %s28_s19 }
   0x4   :  { %s215_s20 = smov 128   ;;  %s216_s21 = smov 8  }
   0x5   :  { %23 = dma.hbm_to_vmem [thread:$0]  %s16_s14, 256, %s18_s16, [#allocation3], %s215_s20, %s215_s20, %s216_s21  }
   0x6   :  { %s217_s22 = smov [#allocation5]  }
   0x7   :  { %s30_s23 = sshll.u32 %s217_s22, 4  ;;  %s31_s23 = int_to_ptr.vmem [resolvable:$true] %s30_s23 }
   0x8   :  { %36 = dma.hbm_to_vmem [thread:$0]  %s29_s19, 2048, %s31_s23, [#allocation6], %s215_s20, %s215_s20, %s216_s21  }
   0x9   :  { %208 = dma.done.wait [#allocation3], 256  }
   0xa   :  { %209 = vsyncadd [#allocation3], 4294967040 }
   0xb   :  { %210 = dma.done.wait [#allocation6], 2048  }
   0xc   :  { %211 = vsyncadd [#allocation6], 4294965248  ;;  %v64_v0 = vld [vmem:[#allocation5 + $0x78] sm:$0xff]  ;;  %v63_v1 = vld [vmem:[#allocation5 + $0x70] sm:$0xff]  ;;  %s218_s24 = smov [#allocation7]   ;;  %s100_s28 = sshll.u32 %s263_s3, 4  ;;  %s101_s28 = int_to_ptr.hbm [resolvable:$true] %s100_s28 }
   0xd   :  { %69 = vmatpush.msra.mxu0 %v64_v0  ;;  %114 = vmatpush.msra.mxu1 %v64_v0  ;;  %v62_v2 = vld [vmem:[#allocation5 + $0x68] sm:$0xff]  ;;  %v61_v3 = vld [vmem:[#allocation5 + $0x60] sm:$0xff]  ;;  %v60_v4 = vld [vmem:[#allocation5 + $0x58] sm:$0xff]  ;;  %s98_s25 = sshll.u32 %s218_s24, 4  ;;  %s99_s25 = int_to_ptr.vmem [resolvable:$true] %s98_s25 }
   0xe   :  { %v59_v5 = vld [vmem:[#allocation5 + $0x50] sm:$0xff]  ;;  %v58_v6 = vld [vmem:[#allocation5 + $0x48] sm:$0xff]  ;;  %v57_v7 = vld [vmem:[#allocation5 + $0x40] sm:$0xff] }
   0xf   :  { %70 = vmatpush.msra.mxu0 %v63_v1  ;;  %115 = vmatpush.msra.mxu1 %v63_v1  ;;  %v56_v8 = vld [vmem:[#allocation5 + $0x38] sm:$0xff]  ;;  %v55_v9 = vld [vmem:[#allocation5 + $0x30] sm:$0xff]  ;;  %v54_v10 = vld [vmem:[#allocation5 + $0x28] sm:$0xff] }
  0x10   :  { %v53_v11 = vld [vmem:[#allocation5 + $0x20] sm:$0xff]  ;;  %v52_v12 = vld [vmem:[#allocation5 + $0x18] sm:$0xff]  ;;  %v51_v13 = vld [vmem:[#allocation5 + $0x10] sm:$0xff] }
  0x11   :  { %71 = vmatpush.msra.mxu0 %v62_v2  ;;  %116 = vmatpush.msra.mxu1 %v62_v2  ;;  %v50_v14 = vld [vmem:[#allocation5 + $0x8] sm:$0xff]  ;;  %v49_v15 = vld [vmem:[#allocation5] sm:$0xff]  ;;  %v47_v16 = vld [vmem:[#allocation2] sm:$0xff] }
  0x12   :  { %v48_v17 = vld [vmem:[#allocation2 + $0x8] sm:$0xff]  ;;  %v135_v18 = vld [vmem:[%s262_s2] ss:$0 sm:$0xff] }
  0x13   :  { %72 = vmatpush.msra.mxu0 %v61_v3  ;;  %117 = vmatpush.msra.mxu1 %v61_v3 }
  0x15   :  { %73 = vmatpush.msra.mxu0 %v60_v4  ;;  %118 = vmatpush.msra.mxu1 %v60_v4 }
  0x17   :  { %74 = vmatpush.msra.mxu0 %v59_v5  ;;  %119 = vmatpush.msra.mxu1 %v59_v5 }
  0x19   :  { %75 = vmatpush.msra.mxu0 %v58_v6  ;;  %120 = vmatpush.msra.mxu1 %v58_v6 }
  0x1b   :  { %76 = vmatpush.msra.mxu0 %v57_v7  ;;  %121 = vmatpush.msra.mxu1 %v57_v7 }
  0x1d   :  { %77 = vmatpush.msra.mxu0 %v56_v8  ;;  %122 = vmatpush.msra.mxu1 %v56_v8 }
  0x1f   :  { %78 = vmatpush.msra.mxu0 %v55_v9  ;;  %123 = vmatpush.msra.mxu1 %v55_v9 }
  0x21   :  { %79 = vmatpush.msra.mxu0 %v54_v10  ;;  %124 = vmatpush.msra.mxu1 %v54_v10 }
  0x23   :  { %80 = vmatpush.msra.mxu0 %v53_v11  ;;  %125 = vmatpush.msra.mxu1 %v53_v11 }
  0x25   :  { %81 = vmatpush.msra.mxu0 %v52_v12  ;;  %126 = vmatpush.msra.mxu1 %v52_v12 }
  0x27   :  { %82 = vmatpush.msra.mxu0 %v51_v13  ;;  %127 = vmatpush.msra.mxu1 %v51_v13 }
  0x29   :  { %83 = vmatpush.msra.mxu0 %v50_v14  ;;  %128 = vmatpush.msra.mxu1 %v50_v14 }
  0x2b   :  { %84 = vmatpush.msra.mxu0 %v49_v15  ;;  %129 = vmatpush.msra.mxu1 %v49_v15 }
  0x2c   :  { %85 = vmatmul.f32.vlgmr.msra.gmra.mxu0 %v47_v16  ;;  %88 = vmatmul.f32.vlgmr.msra.gmra.mxu1 %v48_v17 }
  0xa9   :  { %v86_v19 = vpop.f32.mrf.mxu0  ;;  %v89_v20 = vpop.f32.mrf.mxu1 }
  0xaa   :  { %v87_v21 = vadd.f32 %v135_v18, %v86_v19  ;;  %v90_v22 = vadd.f32 %v135_v18, %v89_v20 }
  0xac   :  { %92 = vst [vmem:[#allocation7] sm:$0xff] %v87_v21 }
  0xad   :  { %93 = vst [vmem:[#allocation7 + $0x8] sm:$0xff] %v90_v22 }
  0xae   :  { %106 = dma.vmem_to_hbm [thread:$0]  %s99_s25, 256, %s101_s28, [#allocation4], %s215_s20, %s215_s20, %s216_s21  }
  0xaf   :  { %212 = dma.done.wait [#allocation4], 256  }
  0xb0   :  { %213 = vsyncadd [#allocation4], 4294967040 }
  0xb1   :  { %111 = vsyncpa [#allocation3], 1 }
  0xb2   :  { %112 = vsyncpa [#allocation6], 1 }
  0xb3   :  { %113 = vsyncpa [#allocation4], 1 }

</bundles_post_ra>
